<compile_context>
chip_gen: v6e
topology: v6e:2x2x1
jax: 0.10.0
libtpu: 0.0.40
codegen_flags: <defaults>
</compile_context>

<pallas_src>
import jax
import jax.numpy as jnp
from jax.experimental import pallas as pl
from jax.experimental.pallas import tpu as pltpu


def _round_up(x: int, m: int) -> int:
    return ((x + m - 1) // m) * m


def _hw_vmem_bytes() -> int:
    """Per-TensorCore VMEM capacity; conservative 64 MiB (v7x) if the query fails."""
    try:
        info = pltpu.get_tpu_info()
        for attr in ("vmem_capacity_bytes", "vmem_size_bytes", "vmem_bytes"):
            v = getattr(info, attr, None)
            if v:
                return int(v)
    except Exception:
        pass
    return 64 << 20


def _make_encoder_kernel(num_hidden: int):
    """Kernel closure: x tile -> hidden stack -> fused (mean|log) head, all in VMEM."""

    def kernel(*refs):
        x_ref = refs[0]
        out_ref = refs[-1]
        p_refs = refs[1:-1]          # (w, b) per hidden layer, then fused head (w, b)

        h = x_ref[...]
        for layer in range(num_hidden):
            w = p_refs[2 * layer][...]
            b = p_refs[2 * layer + 1][...]
            # cast to weight dtype (bf16) right before the MXU pass; accumulate in
            # f32; bias add / ReLU run on the VPU in f32 (hidden under the MXU).
            h = jnp.dot(h.astype(w.dtype), w,
                        preferred_element_type=jnp.float32) + b
            if layer > 0:            # hidden[0] has NO ReLU (matches reference forward)
                h = jnp.maximum(h, 0.0)

        wh = p_refs[2 * num_hidden][...]
        bh = p_refs[2 * num_hidden + 1][...]
        z = jnp.dot(h.astype(wh.dtype), wh,
                    preferred_element_type=jnp.float32) + bh
        out_ref[...] = jnp.maximum(z, 0.0)   # ReLU on both (fused) heads

    return kernel


def encoder_forward(x, params, *, tile_b=None, use_bf16=True):
    """Full Encoder forward in one Pallas kernel, tiled over the batch.

    params: list of (w, b) with w stored as [in, out]; the last two entries are the
    mean / log heads.  Returns (z_mean, z_log), each [B, latent_dim] float32.
    """
    B, F = x.shape
    hidden = params[:-2]
    (wm, bm), (wl, bl) = params[-2], params[-1]
    num_hidden = len(hidden)
    latent = wm.shape[1]
    L2 = 2 * latent
    w_dtype = jnp.bfloat16 if use_bf16 else jnp.float32
    LANE = 128

    # ---- hidden widths -> 128-lane multiples (zero cols + zero bias; the next layer
    # gets matching zero rows on its K side), so every intermediate vreg is lane-dense.
    w_list = []
    prev_pad = 0
    for (w, b) in hidden:
        n_out = w.shape[1]
        n_pad = _round_up(n_out, LANE) - n_out
        w = jnp.pad(w, ((0, prev_pad), (0, n_pad)))
        b = jnp.pad(b, ((0, 0), (0, n_pad)))
        w_list += [w.astype(w_dtype), b.astype(jnp.float32)]
        prev_pad = n_pad

    # ---- fuse mean|log heads into ONE matmul; output stays at 2*latent lanes ----
    wh = jnp.pad(jnp.concatenate([wm, wl], axis=1), ((0, prev_pad), (0, 0)))
    bh = jnp.concatenate([bm, bl], axis=1)
    w_list += [wh.astype(w_dtype), bh.astype(jnp.float32)]
    w_bytes = sum(int(a.size) * a.dtype.itemsize for a in w_list)

    # ---- hardware-aware VMEM budget ----
    budget = int(0.85 * _hw_vmem_bytes())          # headroom below physical VMEM

    # ---- batch tile: big, sublane-aligned; ragged last tile handled by Pallas ----
    SUB = {4: 8, 2: 16, 1: 32}.get(x.dtype.itemsize, 8)
    if tile_b is None:
        if B <= 2 * LANE:
            # modest batch: >=2 grid steps so v7x's second TensorCore isn't idle
            tile_b = max(SUB, _round_up(pl.cdiv(B, 2), SUB))
        else:
            # large batch: big 128-aligned tiles amortize per-step overhead
            # (same guidance on v5e/v6e/v7x — do not shrink tiles on v5e)
            tile_b = min(512, _round_up(pl.cdiv(B, 2), LANE))
    else:
        tile_b = max(SUB, (tile_b // SUB) * SUB)
        tile_b = min(tile_b, _round_up(B, SUB))
    # clamp so double-buffered activations + (conservatively double-buffered)
    # weights fit the hardware budget
    row_bytes = 2 * (F * x.dtype.itemsize + L2 * 4)
    max_rows = (budget - 2 * w_bytes - (4 << 20)) // max(row_bytes, 1)
    tile_b = max(SUB, min(tile_b, (max_rows // SUB) * SUB))

    grid = (pl.cdiv(B, tile_b),)

    dims = [F] + [w_list[2 * i].shape[1] for i in range(num_hidden)]
    flops = sum(2 * B * dims[i] * dims[i + 1] for i in range(len(dims) - 1))
    flops += 2 * B * dims[-1] * L2
    bytes_accessed = B * F * x.dtype.itemsize + B * L2 * 4 + w_bytes

    out_shape = jax.ShapeDtypeStruct((B, L2), jnp.float32)
    kernel = _make_encoder_kernel(num_hidden)

    def build(single_buffer_weights):
        extra = ({"pipeline_mode": pl.Buffered(1)}
                 if single_buffer_weights else {})

        def wspec(shape):
            # constant index_map -> weights resident across the whole batch grid
            return pl.BlockSpec(shape, lambda i: (0,) * len(shape), **extra)

        in_specs = [pl.BlockSpec((tile_b, F), lambda i: (i, 0))]
        in_specs += [wspec(a.shape) for a in w_list]
        out_spec = pl.BlockSpec((tile_b, L2), lambda i: (i, 0))

        w_buffers = 1 if single_buffer_weights else 2
        vmem_needed = (2 * tile_b * F * x.dtype.itemsize     # x: double-buffered
                       + 2 * tile_b * L2 * 4                 # out: double-buffered
                       + w_buffers * w_bytes)                 # weights
        vmem_limit = min(max(int(1.3 * vmem_needed) + (4 << 20), 16 << 20), budget)

        return pl.pallas_call(
            kernel,
            out_shape=out_shape,
            grid_spec=pl.GridSpec(grid=grid, in_specs=in_specs, out_specs=out_spec),
            compiler_params=pltpu.CompilerParams(
                dimension_semantics=("parallel",),            # megacore split on v7x
                vmem_limit_bytes=vmem_limit),
            cost_estimate=pl.CostEstimate(
                flops=flops, transcendentals=0, bytes_accessed=bytes_accessed),
        )

    if hasattr(pl, "Buffered"):
        try:
            out = build(single_buffer_weights=True)(x, *w_list)
        except Exception as e:
            # retry ONLY if the failure is about the pipeline_mode / Buffered request;
            # genuine lowering/compile errors are re-raised.
            msg = str(e).lower()
            if not any(t in msg for t in ("pipeline_mode", "pipeline mode",
                                          "buffered", "buffer_count")):
                raise
            out = build(single_buffer_weights=False)(x, *w_list)
    else:
        out = build(single_buffer_weights=False)(x, *w_list)

    z_mean = out[:, :latent]
    z_log = out[:, latent:]
    return z_mean, z_log


def init_encoder_params(key, input_shape, latent_dim, depth=2):
    """Deterministic init mimicking PyTorch nn.Linear default (uniform +-1/sqrt(fan_in)).
    Weights stored as [in, out] (transposed vs. PyTorch) for x @ W."""
    dims = [int(input_shape / 2 ** i) for i in range(depth + 1)]
    params = []
    keys = jax.random.split(key, depth + 2)
    for i in range(depth):
        fan_in, fan_out = dims[i], dims[i + 1]
        bound = 1.0 / (fan_in ** 0.5)
        kw, kb = jax.random.split(keys[i])
        w = jax.random.uniform(kw, (fan_in, fan_out), jnp.float32, -bound, bound)
        b = jax.random.uniform(kb, (1, fan_out), jnp.float32, -bound, bound)
        params.append((w, b))
    fan_in = dims[depth]
    bound = 1.0 / (fan_in ** 0.5)
    for k in keys[depth:depth + 2]:
        kw, kb = jax.random.split(k)
        w = jax.random.uniform(kw, (fan_in, latent_dim), jnp.float32, -bound, bound)
        b = jax.random.uniform(kb, (1, latent_dim), jnp.float32, -bound, bound)
        params.append((w, b))
    return params


def encoder_ref(x, params):
    """Pure-JAX f32 reference reproducing the PyTorch forward exactly."""
    hidden = params[:-2]
    (wm, bm), (wl, bl) = params[-2], params[-1]
    h = x @ hidden[0][0] + hidden[0][1]          # hidden[0], no ReLU
    for (w, b) in hidden[1:]:
        h = jnp.maximum(h @ w + b, 0.0)          # hidden[1:] + ReLU
    zm = jnp.maximum(h @ wm + bm, 0.0)
    zl = jnp.maximum(h @ wl + bl, 0.0)
    return zm, zl


if __name__ == "__main__":
    B = 8
    input_shape = 64
    latent_dim = 16
    depth = 2

    key = jax.random.PRNGKey(0)
    kx, kp = jax.random.split(key)
    x = jax.random.normal(kx, (B, input_shape), jnp.float32)
    params = init_encoder_params(kp, input_shape, latent_dim, depth)

    z_mean, z_log = encoder_forward(x, params)
    jax.block_until_ready((z_mean, z_log))

    zm_ref, zl_ref = encoder_ref(x, params)
    assert z_mean.shape == (B, latent_dim) and z_log.shape == (B, latent_dim)
    # bf16 MXU inputs with f32 accumulation -> relaxed tolerance vs the f32 reference
    assert jnp.allclose(z_mean, zm_ref, atol=3e-2, rtol=3e-2)
    assert jnp.allclose(z_log, zl_ref, atol=3e-2, rtol=3e-2)

    # second run: multi-step grid with a ragged last tile (B=300, tile 128 -> 128/128/44)
    B2 = 300
    x2 = jax.random.normal(jax.random.PRNGKey(1), (B2, input_shape), jnp.float32)
    zm2, zl2 = encoder_forward(x2, params, tile_b=128)
    jax.block_until_ready((zm2, zl2))
    zm2_ref, zl2_ref = encoder_ref(x2, params)
    assert zm2.shape == (B2, latent_dim) and zl2.shape == (B2, latent_dim)
    assert jnp.allclose(zm2, zm2_ref, atol=3e-2, rtol=3e-2)
    assert jnp.allclose(zl2, zl2_ref, atol=3e-2, rtol=3e-2)

    print("KERNEL_OK")
</pallas_src>

<mosaic_0001>
module attributes {stable_mosaic.version = 11 : i64} {
  func.func @kernel(%arg0: i32, %arg1: memref<8x64xf32, #tpu.memory_space<vmem>>, %arg2: memref<64x128xbf16, #tpu.memory_space<vmem>>, %arg3: memref<1x128xf32, #tpu.memory_space<vmem>>, %arg4: memref<128x128xbf16, #tpu.memory_space<vmem>>, %arg5: memref<1x128xf32, #tpu.memory_space<vmem>>, %arg6: memref<128x32xbf16, #tpu.memory_space<vmem>>, %arg7: memref<1x32xf32, #tpu.memory_space<vmem>>, %arg8: memref<8x32xf32, #tpu.memory_space<vmem>>) attributes {dimension_semantics = [#tpu.dimension_semantics<parallel>], iteration_bounds = array<i64: 1>, scalar_prefetch = 0 : i64, scratch_operands = 0 : i64, tpu.core_type = #tpu.core_type<tc>, window_params = [{transform_indices = @transform_0, window_bounds = array<i64: 8, 64>}, {pipeline_mode = #tpu.pipeline_mode<synchronous>, transform_indices = @transform_1, window_bounds = array<i64: 64, 128>}, {pipeline_mode = #tpu.pipeline_mode<synchronous>, transform_indices = @transform_2, window_bounds = array<i64: 1, 128>}, {pipeline_mode = #tpu.pipeline_mode<synchronous>, transform_indices = @transform_3, window_bounds = array<i64: 128, 128>}, {pipeline_mode = #tpu.pipeline_mode<synchronous>, transform_indices = @transform_4, window_bounds = array<i64: 1, 128>}, {pipeline_mode = #tpu.pipeline_mode<synchronous>, transform_indices = @transform_5, window_bounds = array<i64: 128, 32>}, {pipeline_mode = #tpu.pipeline_mode<synchronous>, transform_indices = @transform_6, window_bounds = array<i64: 1, 32>}, {transform_indices = @transform_7, window_bounds = array<i64: 8, 32>}]} {
    %c0 = arith.constant 0 : index
    %c0_0 = arith.constant 0 : index
    %0 = vector.load %arg1[%c0, %c0_0] : memref<8x64xf32, #tpu.memory_space<vmem>>, vector<8x64xf32>
    %c0_1 = arith.constant 0 : index
    %c0_2 = arith.constant 0 : index
    %1 = vector.load %arg2[%c0_1, %c0_2] : memref<64x128xbf16, #tpu.memory_space<vmem>>, vector<64x128xbf16>
    %c0_3 = arith.constant 0 : index
    %c0_4 = arith.constant 0 : index
    %2 = vector.load %arg3[%c0_3, %c0_4] : memref<1x128xf32, #tpu.memory_space<vmem>>, vector<1x128xf32>
    %3 = arith.truncf %0 : vector<8x64xf32> to vector<8x64xbf16>
    %cst = arith.constant dense<0.000000e+00> : vector<8x128xf32>
    %4 = tpu.matmul %3, %1, %cst {dimension_numbers = #tpu.dot_dimension_numbers<[1], [0], [0], [1], [0, 0, 1, 1], [], []>} : vector<8x64xbf16>, vector<64x128xbf16>, vector<8x128xf32> -> vector<8x128xf32>
    %5 = vector.broadcast %2 : vector<1x128xf32> to vector<8x128xf32>
    %6 = arith.addf %4, %5 : vector<8x128xf32>
    %c0_5 = arith.constant 0 : index
    %c0_6 = arith.constant 0 : index
    %7 = vector.load %arg4[%c0_5, %c0_6] : memref<128x128xbf16, #tpu.memory_space<vmem>>, vector<128x128xbf16>
    %c0_7 = arith.constant 0 : index
    %c0_8 = arith.constant 0 : index
    %8 = vector.load %arg5[%c0_7, %c0_8] : memref<1x128xf32, #tpu.memory_space<vmem>>, vector<1x128xf32>
    %9 = arith.truncf %6 : vector<8x128xf32> to vector<8x128xbf16>
    %cst_9 = arith.constant dense<0.000000e+00> : vector<8x128xf32>
    %10 = tpu.matmul %9, %7, %cst_9 {dimension_numbers = #tpu.dot_dimension_numbers<[1], [0], [0], [1], [0, 0, 1, 1], [], []>} : vector<8x128xbf16>, vector<128x128xbf16>, vector<8x128xf32> -> vector<8x128xf32>
    %11 = vector.broadcast %8 : vector<1x128xf32> to vector<8x128xf32>
    %12 = arith.addf %10, %11 : vector<8x128xf32>
    %cst_10 = arith.constant 0.000000e+00 : f32
    %13 = vector.broadcast %cst_10 : f32 to vector<8x128xf32>
    %14 = arith.maximumf %12, %13 : vector<8x128xf32>
    %c0_11 = arith.constant 0 : index
    %c0_12 = arith.constant 0 : index
    %15 = vector.load %arg6[%c0_11, %c0_12] : memref<128x32xbf16, #tpu.memory_space<vmem>>, vector<128x32xbf16>
    %c0_13 = arith.constant 0 : index
    %c0_14 = arith.constant 0 : index
    %16 = vector.load %arg7[%c0_13, %c0_14] : memref<1x32xf32, #tpu.memory_space<vmem>>, vector<1x32xf32>
    %17 = arith.truncf %14 : vector<8x128xf32> to vector<8x128xbf16>
    %cst_15 = arith.constant dense<0.000000e+00> : vector<8x32xf32>
    %18 = tpu.matmul %17, %15, %cst_15 {dimension_numbers = #tpu.dot_dimension_numbers<[1], [0], [0], [1], [0, 0, 1, 1], [], []>} : vector<8x128xbf16>, vector<128x32xbf16>, vector<8x32xf32> -> vector<8x32xf32>
    %19 = vector.broadcast %16 : vector<1x32xf32> to vector<8x32xf32>
    %20 = arith.addf %18, %19 : vector<8x32xf32>
    %cst_16 = arith.constant 0.000000e+00 : f32
    %21 = vector.broadcast %cst_16 : f32 to vector<8x32xf32>
    %22 = arith.maximumf %20, %21 : vector<8x32xf32>
    %c0_17 = arith.constant 0 : index
    %c0_18 = arith.constant 0 : index
    %23 = vector.load %arg8[%c0_17, %c0_18] : memref<8x32xf32, #tpu.memory_space<vmem>>, vector<8x32xf32>
    tpu.vector_store %arg8[%c0_17, %c0_18], %22 {strides = array<i32>} : memref<8x32xf32, #tpu.memory_space<vmem>>, vector<8x32xf32>,
    return
  }
  func.func @transform_0(%arg0: i32) -> (i32, i32) {
    %c0_i32 = arith.constant 0 : i32
    %c0_i32_0 = arith.constant 0 : i32
    return %arg0, %c0_i32 : i32, i32
  }
  func.func @transform_1(%arg0: i32) -> (i32, i32) {
    %c0_i32 = arith.constant 0 : i32
    %c0_i32_0 = arith.constant 0 : i32
    %c0_i32_1 = arith.constant 0 : i32
    return %c0_i32, %c0_i32_0 : i32, i32
  }
  func.func @transform_2(%arg0: i32) -> (i32, i32) {
    %c0_i32 = arith.constant 0 : i32
    %c0_i32_0 = arith.constant 0 : i32
    %c0_i32_1 = arith.constant 0 : i32
    return %c0_i32, %c0_i32_0 : i32, i32
  }
  func.func @transform_3(%arg0: i32) -> (i32, i32) {
    %c0_i32 = arith.constant 0 : i32
    %c0_i32_0 = arith.constant 0 : i32
    %c0_i32_1 = arith.constant 0 : i32
    return %c0_i32, %c0_i32_0 : i32, i32
  }
  func.func @transform_4(%arg0: i32) -> (i32, i32) {
    %c0_i32 = arith.constant 0 : i32
    %c0_i32_0 = arith.constant 0 : i32
    %c0_i32_1 = arith.constant 0 : i32
    return %c0_i32, %c0_i32_0 : i32, i32
  }
  func.func @transform_5(%arg0: i32) -> (i32, i32) {
    %c0_i32 = arith.constant 0 : i32
    %c0_i32_0 = arith.constant 0 : i32
    %c0_i32_1 = arith.constant 0 : i32
    return %c0_i32, %c0_i32_0 : i32, i32
  }
  func.func @transform_6(%arg0: i32) -> (i32, i32) {
    %c0_i32 = arith.constant 0 : i32
    %c0_i32_0 = arith.constant 0 : i32
    %c0_i32_1 = arith.constant 0 : i32
    return %c0_i32, %c0_i32_0 : i32, i32
  }
  func.func @transform_7(%arg0: i32) -> (i32, i32) {
    %c0_i32 = arith.constant 0 : i32
    %c0_i32_0 = arith.constant 0 : i32
    return %arg0, %c0_i32 : i32, i32
  }
}

</mosaic_0001>

<bundles_post_ra>
// kernel: tpu_custom_call.1
= control target key start
LH: loop header
LB: loop body
LE: loop exit
PB: predicated region body
PF: predicated region fallthrough
CT: control target
= control target key end

     0   :  { %12 = vsyncpa [#allocation3], 0  ;;  %s677_s0 = inlined_call_operand.vmem [shape: f32[8,64], index: 0, kind: input, shape index: {}]   ;;  %s678_s1 = inlined_call_operand.hbm [shape: bf16[64,128], index: 1, kind: input, shape index: {}]   ;;  %s679_s2 = inlined_call_operand.vmem [shape: f32[1,128], index: 2, kind: input, shape index: {}]   ;;  %s680_s3 = inlined_call_operand.vmem [shape: bf16[128,128], index: 3, kind: input, shape index: {}]   ;;  %s681_s4 = inlined_call_operand.vmem [shape: f32[1,128], index: 4, kind: input, shape index: {}]   ;;  %s682_s5 = inlined_call_operand.vmem [shape: bf16[128,32], index: 5, kind: input, shape index: {}]   ;;  %s683_s6 = inlined_call_operand.vmem [shape: f32[1,32], index: 6, kind: input, shape index: {}]   ;;  %s684_s7 = inlined_call_operand.hbm [shape: f32[8,32], index: 7, kind: output, shape index: {}]  }
   0x1   :  { %13 = vsyncpa [#allocation4], 0  ;;  %s539_s24 = smov [#allocation2]  }
   0x2   :  { %s21_s25 = sshll.u32 %s539_s24, 4  ;;  %s22_s25 = int_to_ptr.vmem [resolvable:$true] %s21_s25 }
   0x3   :  { %s503_s26 = scalar_lea.vmem %s22_s25, 512  ;;  %p508_p1 = scmp.lt.s32.totalorder %s22_s25, %s22_s25 }
   0x4   :  { %p504_p0 = scmp.ne.s32.totalorder %s22_s25, %s503_s26  ;;  %p509_p2 = scmp.lt.s32.totalorder %s503_s26, %s503_s26 }
   0x6   :  { %p510_p3 = por %p509_p2, %p508_p1 }
   0x8   :  { %p511_p4 = pnand %p510_p3, %p504_p0 }
   0xa   :  { %514 = shalt.err (!%p511_p4)
}
   0xb   :  { %s540_s27 = smov 64   ;;  %s541_s28 = smov 4  }
   0xc   :  { %27 = dma.hbm_to_vmem [thread:$0]  %s678_s1, 512, %s22_s25, [#allocation3], %s540_s27, %s540_s27, %s541_s28  }
   0xd   :  { %535 = dma.done.wait [#allocation3], 512  }
   0xe   :  { %536 = vsyncadd [#allocation3], 4294966784  ;;  %v542_v0 = vmov 0.0   ;;  %vm543_vm0 = vmmov 0   ;;  %v475_v1 = vld [vmem:[#allocation2 + $0x18] sm:$0xff]   ;;  %v476_v2 = vld [vmem:[#allocation2 + $0x10] sm:$0xff]  }
   0xf   :  { %417 = vmatprep.subr.bf16.mxu0 %v542_v0  ;;  %425 = vmatprep.mubr.msk.bf16.mxu0 %vm543_vm0, %v542_v0  ;;  %v479_v3 = vld [vmem:[%s680_s3 + $0x38] sm:$0xff]   ;;  %v477_v4 = vld [vmem:[#allocation2 + $0x8] sm:$0xff]   ;;  %v480_v5 = vld [vmem:[%s680_s3 + $0x30] sm:$0xff]   ;;  %vm83_vm1 = vcmask 523264   ;;  %s544_s19 = smov [#allocation5]   ;;  %vm353_vm2 = vcmask 261120  }
  0x10   :  { %429 = vmatprep.subr.bf16.mxu1 %v542_v0  ;;  %445 = vmatprep.mubr.msk.bf16.mxu1 %vm543_vm0, %v542_v0  ;;  %v478_v6 = vld [vmem:[#allocation2] sm:$0xff]   ;;  %v481_v8 = vld [vmem:[%s680_s3 + $0x28] sm:$0xff]   ;;  %v483_v11 = vld [vmem:[%s680_s3 + $0x18] sm:$0xff]  }
  0x11   :  { %418 = vmatpush3.bf16.msra.mxu0 %v475_v1  ;;  %430 = vmatpush3.bf16.msra.mxu1 %v479_v3  ;;  %v42_v7 = vld [vmem:[%s677_s0] sm:$0xff]  ;;  %v484_v12 = vld [vmem:[%s680_s3 + $0x10] sm:$0xff]   ;;  %v485_v13 = vld [vmem:[%s680_s3 + $0x8] sm:$0xff]  }
  0x12   :  { %419 = vmatprep.subr.bf16.mxu0 %v542_v0  ;;  %431 = vmatprep.subr.bf16.mxu1 %v542_v0  ;;  %v52_v9 = vpack.c.bf16 %v42_v7, %v42_v7  ;;  %v482_v10 = vld [vmem:[%s680_s3 + $0x20] sm:$0xff]   ;;  %v487_v15 = vld [vmem:[%s682_s5 + $0x38] sm:$0xff]   ;;  %v488_v16 = vld [vmem:[%s682_s5 + $0x30] sm:$0xff]  }
  0x13   :  { %v486_v14 = vld [vmem:[%s680_s3] sm:$0xff]   ;;  %v489_v17 = vld [vmem:[%s682_s5 + $0x28] sm:$0xff]   ;;  %v491_v19 = vld [vmem:[%s682_s5 + $0x18] sm:$0xff]  }
  0x14   :  { %v490_v18 = vld [vmem:[%s682_s5 + $0x20] sm:$0xff]   ;;  %v492_v20 = vld [vmem:[%s682_s5 + $0x10] sm:$0xff]   ;;  %v493_v28 = vld [vmem:[%s682_s5 + $0x8] sm:$0xff]  }
  0x15   :  { %420 = vmatpush3.bf16.msra.mxu0 %v476_v2  ;;  %432 = vmatpush3.bf16.msra.mxu1 %v480_v5  ;;  %v370_v21 = vld [vmem:[%s679_s2] ss:$0 sm:$0xff] }
  0x16   :  { %421 = vmatprep.subr.bf16.mxu0 %v542_v0  ;;  %433 = vmatprep.subr.bf16.mxu1 %v542_v0  ;;  %v494_v29 = vld [vmem:[%s682_s5] sm:$0xff]   ;;  %s361_s5 = sshll.u32 %s544_s19, 4  ;;  %s362_s5 = int_to_ptr.vmem [resolvable:$true] %s361_s5 }
  0x17   :  { %v376_v30 = vld [vmem:[%s681_s4] ss:$0 sm:$0xff]  ;;  %s515_s4 = scalar_lea.vmem %s362_s5, 128  ;;  %p520_p6 = scmp.lt.s32.totalorder %s362_s5, %s362_s5 }
  0x18   :  { %v385_v38 = vld [vmem:[%s683_s6] ss:$0 sm:$0xff]  ;;  %p516_p5 = scmp.ne.s32.totalorder %s362_s5, %s515_s4  ;;  %p521_p7 = scmp.lt.s32.totalorder %s515_s4, %s515_s4 }
  0x19   :  { %422 = vmatpush3.bf16.msra.mxu0 %v477_v4  ;;  %434 = vmatpush3.bf16.msra.mxu1 %v481_v8 }
  0x1a   :  { %423 = vmatprep.subr.bf16.mxu0 %v542_v0  ;;  %435 = vmatprep.subr.bf16.mxu1 %v542_v0  ;;  %p522_p8 = por %p521_p7, %p520_p6 }
  0x1c   :  { %p523_p9 = pnand %p522_p8, %p516_p5 }
  0x1d   :  { %424 = vmatpush3.bf16.msra.mxu0 %v478_v6  ;;  %436 = vmatpush3.bf16.msra.mxu1 %v482_v10 }
  0x1e   :  { %449 = vmatprep.subr.bf16.mxu0 %v542_v0  ;;  %437 = vmatprep.subr.bf16.mxu1 %v542_v0 }
  0x20   :  { %426 = vmatmul.mubr.msk.bf16.vlgmr.msra.gmra.mxu0 %vm83_vm1, %v52_v9 }
  0x21   :  { %465 = vmatprep.mubr.msk.bf16.mxu0 %vm543_vm0, %v542_v0  ;;  %438 = vmatpush3.bf16.msra.mxu1 %v483_v11 }
  0x22   :  { %439 = vmatprep.subr.bf16.mxu1 %v542_v0  ;;  %450 = vmatpush3.bf16.msra.mxu0 %v487_v15 }
  0x23   :  { %451 = vmatprep.subr.bf16.mxu0 %v542_v0 }
  0x25   :  { %440 = vmatpush3.bf16.msra.mxu1 %v484_v12 }
  0x26   :  { %441 = vmatprep.subr.bf16.mxu1 %v542_v0  ;;  %452 = vmatpush3.bf16.msra.mxu0 %v488_v16 }
  0x27   :  { %453 = vmatprep.subr.bf16.mxu0 %v542_v0 }
  0x29   :  { %442 = vmatpush3.bf16.msra.mxu1 %v485_v13 }
  0x2a   :  { %443 = vmatprep.subr.bf16.mxu1 %v542_v0  ;;  %454 = vmatpush3.bf16.msra.mxu0 %v489_v17 }
  0x2b   :  { %455 = vmatprep.subr.bf16.mxu0 %v542_v0 }
  0x2d   :  { %444 = vmatpush3.bf16.msra.mxu1 %v486_v14 }
  0x2e   :  { %456 = vmatpush3.bf16.msra.mxu0 %v490_v18 }
  0x2f   :  { %457 = vmatprep.subr.bf16.mxu0 %v542_v0 }
  0x32   :  { %458 = vmatpush3.bf16.msra.mxu0 %v491_v19 }
  0x33   :  { %459 = vmatprep.subr.bf16.mxu0 %v542_v0 }
  0x36   :  { %460 = vmatpush3.bf16.msra.mxu0 %v492_v20 }
  0x37   :  { %461 = vmatprep.subr.bf16.mxu0 %v542_v0 }
  0x3a   :  { %462 = vmatpush3.bf16.msra.mxu0 %v493_v28 }
  0x3b   :  { %463 = vmatprep.subr.bf16.mxu0 %v542_v0 }
  0x3e   :  { %464 = vmatpush3.bf16.msra.mxu0 %v494_v29 }
  0xe0   :  { %v121_v22 = vpop.f32.mrf.mxu0 }
  0xe1   :  { %v122_v23 = vadd.f32 %v370_v21, %v121_v22 }
  0xe2   :  { %v427_v24 = vpop.f32.mrf.mxu0 }
  0xe3   :  { %v144_v25 = vpack.c.bf16 %v122_v23, %v122_v23 }
  0xe4   :  { %v124_v26 = vpop.f32.mrf.mxu0 }
  0xe5   :  { %446 = vmatmul.mubr.bf16.vlgmr.msra.gmra.mxu1 %v144_v25 }
  0xe6   :  { %v428_v27 = vpop.f32.mrf.mxu0 }
 0x1a5   :  { %v233_v31 = vpop.f32.mrf.mxu1 }
 0x1a6   :  { %v234_v32 = vadd.f32 %v376_v30, %v233_v31 }
 0x1a7   :  { %v447_v33 = vpop.f32.mrf.mxu1 }
 0x1a8   :  { %v239_v34 = vmax.f32 %v234_v32, 0.0 }
 0x1a9   :  { %v236_v35 = vpop.f32.mrf.mxu1 }
 0x1aa   :  { %v257_v36 = vpack.c.bf16 %v239_v34, %v239_v34 }
 0x1ab   :  { %v448_v37 = vpop.f32.mrf.mxu1 }
 0x1ac   :  { %466 = vmatmul.mubr.bf16.vlgmr.msra.gmra.mxu0 %v257_v36 }
 0x26c   :  { %v346_v39 = vpop.f32.mrf.mxu0 }
 0x26d   :  { %v347_v40 = vadd.f32 %v385_v38, %v346_v39 }
 0x26e   :  { %v467_v41 = vpop.f32.mrf.mxu0 }
 0x26f   :  { %v352_v42 = vmax.f32 %v347_v40, 0.0 }
 0x270   :  { %v349_v43 = vpop.f32.mrf.mxu0 }
 0x271   :  { %354 = vst.msk [vmem:[#allocation5] sm:$0xff] %vm353_vm2, %v352_v42 }
 0x272   :  { %v468_v44 = vpop.f32.mrf.mxu0 }
 0x273   :  { %526 = shalt.err (!%p523_p9)
}
 0x274   :  { %364 = dma.vmem_to_hbm [thread:$0]  %s362_s5, 128, %s684_s7, [#allocation4]  }
 0x275   :  { %537 = dma.done.wait [#allocation4], 128  }
 0x276   :  { %538 = vsyncadd [#allocation4], 4294967168 }
 0x277   :  { %368 = vsyncpa [#allocation3], 1 }
 0x278   :  { %369 = vsyncpa [#allocation4], 1 }

</bundles_post_ra>
